<compile_context>
chip_gen: v7x
topology: tpu7x:2x2x1
jax: 0.10.0
libtpu: 0.0.40
codegen_flags: <defaults>
</compile_context>

<pallas_src>
import functools

import numpy as np
import jax
import jax.numpy as jnp
from jax.experimental import pallas as pl
from jax.experimental.pallas import tpu as pltpu


def _toplayer_kernel(x_ref, w_ref, b_ref, o_ref):
    # x_ref: (N, K, P)   w_ref: (C_out, K, P)   b_ref: (C_out, 1)   o_ref: (N, C_out, P)
    w = w_ref[...]                        # (C_out, K, P) — resident, read once
    b = b_ref[...]                        # (C_out, 1)
    n_batch = x_ref.shape[0]
    for n in range(n_batch):              # tiny static unroll (N == 2)
        xn = x_ref[n]                     # (K, P): positions on lanes, K on sublanes
        # VPU multiply + sublane (XLU) reduce over K -> (C_out, P); all f32.
        acc = jnp.sum(xn[None, :, :] * w, axis=1)
        o_ref[n] = (acc + b).astype(o_ref.dtype)


def prepare_weights_for_kernel(W, kernel_size):
    """One-time re-layout: (C_out, C_in, h, h, k, k) -> (C_out, C_in*k*k, h*h).

    Weights are static across forward calls, so this HBM re-layout is done once
    at parameter-prep time, not per forward.
    """
    C_out, C_in, h, _, k, _ = W.shape
    assert k == kernel_size
    return jnp.transpose(W, (0, 1, 4, 5, 2, 3)).reshape(C_out, C_in * k * k, h * h)


@functools.partial(jax.jit, static_argnames=("kernel_size",))
def toplayer_forward(X, w_ckp, bias, kernel_size):
    """X: (N, C_in, h, h) f32;  w_ckp: (C_out, C_in*k*k, h*h);  bias: (C_out,)."""
    N, C_in, h, _ = X.shape
    C_out = w_ckp.shape[0]
    k = kernel_size
    assert k % 2 == 1
    pad = (k - 1) // 2
    K = C_in * k * k
    P = h * h

    # ---- glue: patches with positions LAST (lane axis), via k*k shifted windows ----
    X_pad = jnp.pad(X, ((0, 0), (0, 0), (pad, pad), (pad, pad)))
    windows = jnp.stack(
        [X_pad[:, :, dy:dy + h, dx:dx + h] for dy in range(k) for dx in range(k)],
        axis=2)                                      # (N, C_in, k*k, h, h)
    x_nkp = windows.reshape(N, K, P)                 # K order = (c_in, dy, dx), p = i*h + j

    bias_col = bias.reshape(C_out, 1)

    # ---- Pallas kernel: single invocation, everything resident in VMEM ----
    out_ncp = pl.pallas_call(
        _toplayer_kernel,
        out_shape=jax.ShapeDtypeStruct((N, C_out, P), jnp.float32),
        in_specs=[
            pl.BlockSpec(memory_space=pltpu.MemorySpace.VMEM),
            pl.BlockSpec(memory_space=pltpu.MemorySpace.VMEM),
            pl.BlockSpec(memory_space=pltpu.MemorySpace.VMEM),
        ],
        out_specs=pl.BlockSpec(memory_space=pltpu.MemorySpace.VMEM),
    )(x_nkp, w_ckp, bias_col)

    # (N, C_out, P) -> (N, C_out, h, h): pure reshape, no transpose pass.
    return out_ncp.reshape(N, C_out, h, h)


def _reference(X, W, bias, kernel_size):
    """Independent plain-JAX replica of the PyTorch 'naive' method."""
    N, C_in, h, _ = X.shape
    C_out = W.shape[0]
    k = kernel_size
    pad = (k - 1) // 2
    X_pad = jnp.pad(X, ((0, 0), (0, 0), (pad, pad), (pad, pad)))
    out = jnp.zeros((N, C_out, h, h), dtype=X.dtype)
    for i in range(h):
        for j in range(h):
            x_sub = X_pad[:, :, i:i + k, j:j + k]      # (N, C_in, k, k)
            w_sub = W[:, :, i, j, :, :]                # (C_out, C_in, k, k)
            val = jnp.einsum('mnop,qnop->mq', x_sub, w_sub)
            out = out.at[:, :, i, j].set(val)
    return out + bias.reshape(1, -1, 1, 1)


if __name__ == "__main__":
    # Small shapes consistent with the module: N=2, C_in=4, C_out=4, h=8, k=3
    batch, channels_in, channels_out, h, kernel_size = 2, 4, 4, 8, 3

    key = jax.random.PRNGKey(0)
    kx, kw = jax.random.split(key)

    X = jax.random.normal(kx, (batch, channels_in, h, h), dtype=jnp.float32)

    # Deterministic weight init mirroring TopLayer.prepare_weights()
    variance = 2.0 / (kernel_size ** 2 * (channels_in + channels_out))
    stddev = float(np.sqrt(variance))
    W = stddev * jax.random.normal(
        kw, (channels_out, channels_in, h, h, kernel_size, kernel_size),
        dtype=jnp.float32)
    bias = jnp.zeros((channels_out,), dtype=jnp.float32)

    # One-time weight re-layout (parameter-prep time, outside the hot path).
    w_ckp = jax.block_until_ready(prepare_weights_for_kernel(W, kernel_size))

    out = toplayer_forward(X, w_ckp, bias, kernel_size)
    out = jax.block_until_ready(out)

    ref = _reference(X, W, bias, kernel_size)
    np.testing.assert_allclose(np.asarray(out), np.asarray(ref), rtol=1e-5, atol=1e-5)

    print("KERNEL_OK")
</pallas_src>

<mosaic_0001>
module attributes {stable_mosaic.version = 11 : i64} {
  func.func @_toplayer_kernel(%arg0: memref<2x36x64xf32, #tpu.memory_space<vmem>>, %arg1: memref<4x36x64xf32, #tpu.memory_space<vmem>>, %arg2: memref<4x1xf32, #tpu.memory_space<vmem>>, %arg3: memref<2x4x64xf32, #tpu.memory_space<vmem>>) attributes {dimension_semantics = [], scalar_prefetch = 0 : i64, scratch_operands = 0 : i64, tpu.core_type = #tpu.core_type<tc>} {
    %c0 = arith.constant 0 : index
    %c0_0 = arith.constant 0 : index
    %c0_1 = arith.constant 0 : index
    %0 = vector.load %arg1[%c0, %c0_0, %c0_1] : memref<4x36x64xf32, #tpu.memory_space<vmem>>, vector<4x36x64xf32>
    %c0_2 = arith.constant 0 : index
    %c0_3 = arith.constant 0 : index
    %1 = vector.load %arg2[%c0_2, %c0_3] : memref<4x1xf32, #tpu.memory_space<vmem>>, vector<4x1xf32>
    %c0_4 = arith.constant 0 : index
    %c0_5 = arith.constant 0 : index
    %c0_6 = arith.constant 0 : index
    %2 = vector.load %arg0[%c0_4, %c0_5, %c0_6] : memref<2x36x64xf32, #tpu.memory_space<vmem>>, vector<1x36x64xf32>
    %3 = vector.shape_cast %2 : vector<1x36x64xf32> to vector<36x64xf32>
    %4 = vector.shape_cast %3 : vector<36x64xf32> to vector<1x36x64xf32>
    %5 = vector.broadcast %4 : vector<1x36x64xf32> to vector<4x36x64xf32>
    %6 = arith.mulf %5, %0 : vector<4x36x64xf32>
    %cst = arith.constant dense<0.000000e+00> : vector<4x64xf32>
    %7 = vector.multi_reduction <add>, %6, %cst [1] : vector<4x36x64xf32> to vector<4x64xf32>
    %8 = vector.broadcast %1 : vector<4x1xf32> to vector<4x64xf32>
    %9 = arith.addf %7, %8 : vector<4x64xf32>
    %c0_7 = arith.constant 0 : index
    %c0_8 = arith.constant 0 : index
    %c0_9 = arith.constant 0 : index
    %10 = vector.load %arg3[%c0_7, %c0_8, %c0_9] : memref<2x4x64xf32, #tpu.memory_space<vmem>>, vector<1x4x64xf32>
    %11 = vector.shape_cast %10 : vector<1x4x64xf32> to vector<4x64xf32>
    %12 = vector.shape_cast %9 : vector<4x64xf32> to vector<1x4x64xf32>
    tpu.vector_store %arg3[%c0_7, %c0_8, %c0_9], %12 {strides = array<i32>} : memref<2x4x64xf32, #tpu.memory_space<vmem>>, vector<1x4x64xf32>,
    %c1 = arith.constant 1 : index
    %c0_10 = arith.constant 0 : index
    %c0_11 = arith.constant 0 : index
    %13 = vector.load %arg0[%c1, %c0_10, %c0_11] : memref<2x36x64xf32, #tpu.memory_space<vmem>>, vector<1x36x64xf32>
    %14 = vector.shape_cast %13 : vector<1x36x64xf32> to vector<36x64xf32>
    %15 = vector.shape_cast %14 : vector<36x64xf32> to vector<1x36x64xf32>
    %16 = vector.broadcast %15 : vector<1x36x64xf32> to vector<4x36x64xf32>
    %17 = arith.mulf %16, %0 : vector<4x36x64xf32>
    %cst_12 = arith.constant dense<0.000000e+00> : vector<4x64xf32>
    %18 = vector.multi_reduction <add>, %17, %cst_12 [1] : vector<4x36x64xf32> to vector<4x64xf32>
    %19 = vector.broadcast %1 : vector<4x1xf32> to vector<4x64xf32>
    %20 = arith.addf %18, %19 : vector<4x64xf32>
    %c1_13 = arith.constant 1 : index
    %c0_14 = arith.constant 0 : index
    %c0_15 = arith.constant 0 : index
    %21 = vector.load %arg3[%c1_13, %c0_14, %c0_15] : memref<2x4x64xf32, #tpu.memory_space<vmem>>, vector<1x4x64xf32>
    %22 = vector.shape_cast %21 : vector<1x4x64xf32> to vector<4x64xf32>
    %23 = vector.shape_cast %20 : vector<4x64xf32> to vector<1x4x64xf32>
    tpu.vector_store %arg3[%c1_13, %c0_14, %c0_15], %23 {strides = array<i32>} : memref<2x4x64xf32, #tpu.memory_space<vmem>>, vector<1x4x64xf32>,
    return
  }
}

</mosaic_0001>

<bundles_post_ra>
// kernel: toplayer_forward.1
= control target key start
LH: loop header
LB: loop body
LE: loop exit
PB: predicated region body
PF: predicated region fallthrough
CT: control target
= control target key end

     0   :  { %v267_v0 = vmov 0   ;;  %vm60_vm0 = vcmask 523264   ;;  %vm68_vm1 = vcmask 519168   ;;  %vm142_vm2 = vcmask 1041409   ;;  %s493_s2 = inlined_call_operand.vmem [shape: f32[4,1], index: 2, kind: input, shape index: {}]   ;;  %s494_s1 = inlined_call_operand.vmem [shape: f32[4,36,64], index: 1, kind: input, shape index: {}]   ;;  %s495_s0 = inlined_call_operand.vmem [shape: f32[2,36,64], index: 0, kind: input, shape index: {}]   ;;  %s496_s3 = inlined_call_operand.vmem [shape: f32[2,4,64], index: 3, kind: output, shape index: {}]  }
   0x1   :  { %266 = vset.pattern.permute.xlu0 %v267_v0  ;;  %v34_v1 = vld [vmem:[%s493_s2] sm:$0xf]  ;;  %v299_v3 = vld [vmem:[%s494_s1 + $0x8] sm:$0xff]  ;;  %v310_v6 = vld [vmem:[%s494_s1 + $0x10] sm:$0xff]  ;;  %vm145_vm3 = vcmask 1042434   ;;  %vm148_vm4 = vcmask 1043459  }
   0x2   :  { %124 = vperm.xlu0 %266, %v34_v1   ;;  %v294_v2 = vld [vmem:[%s494_s1] sm:$0xff]  ;;  %v36_v5 = vld [vmem:[%s495_s0 + $0x8] sm:$0xff]  ;;  %v315_v7 = vld [vmem:[%s494_s1 + $0x18] sm:$0xff] }
   0x3   :  { %v35_v4 = vld [vmem:[%s495_s0] sm:$0xff]  ;;  %v19_v9 = vld [vmem:[%s494_s1 + $0x28] sm:$0xff]  ;;  %v20_v10 = vld [vmem:[%s494_s1 + $0x30] sm:$0xff]  ;;  %v41_v12 = vmul.f32 %v36_v5, %v299_v3 }
   0x4   :  { %v320_v8 = vld [vmem:[%s494_s1 + $0x20] sm:$0xf]  ;;  %v40_v11 = vmul.f32 %v35_v4, %v294_v2  ;;  %v333_v13 = vld [vmem:[%s494_s1 + $0x38] sm:$0xff]  ;;  %v37_v15 = vld [vmem:[%s495_s0 + $0x10] sm:$0xff]  ;;  %v45_v22 = vmul.f32 %v35_v4, %v19_v9  ;;  %v46_v23 = vmul.f32 %v36_v5, %v20_v10 }
   0x5   :  { %v338_v14 = vld [vmem:[%s494_s1 + $0x40] sm:$0xff]  ;;  %v346_v16 = vld [vmem:[%s494_s1 + $0x48] sm:$0xf]  ;;  %v38_v17 = vld [vmem:[%s495_s0 + $0x18] sm:$0xff]  ;;  %v42_v25 = vmul.f32 %v37_v15, %v310_v6  ;;  %v62_v27 = vsel %vm60_vm0, %v41_v12, 0.0  ;;  %v47_v33 = vmul.f32 %v37_v15, %v333_v13 }
   0x6   :  { %v39_v18 = vld [vmem:[%s495_s0 + $0x20] sm:$0xf]  ;;  %v24_v19 = vld [vmem:[%s494_s1 + $0x50] sm:$0xff]  ;;  %v25_v20 = vld [vmem:[%s494_s1 + $0x58] sm:$0xff]  ;;  %v61_v26 = vsel %vm60_vm0, %v40_v11, 0.0  ;;  %v43_v31 = vmul.f32 %v38_v17, %v315_v7  ;;  %v48_v34 = vmul.f32 %v38_v17, %v338_v14  ;;  %v77_v44 = vsel %vm60_vm0, %v45_v22, 0.0 }
   0x7   :  { %v26_v21 = vld [vmem:[%s494_s1 + $0x60] sm:$0xff]  ;;  %v366_v24 = vld [vmem:[%s494_s1 + $0x68] sm:$0xff]  ;;  %v374_v28 = vld [vmem:[%s494_s1 + $0x70] sm:$0xf]  ;;  %v384_v32 = vmul.f32 %v39_v18, %v320_v8  ;;  %v49_v38 = vmul.f32 %v39_v18, %v346_v16  ;;  %v50_v39 = vmul.f32 %v35_v4, %v24_v19  ;;  %v51_v40 = vmul.f32 %v36_v5, %v25_v20 }
   0x8   :  { %v29_v29 = vld [vmem:[%s494_s1 + $0x78] sm:$0xff]  ;;  %v30_v30 = vld [vmem:[%s494_s1 + $0x80] sm:$0xff]  ;;  %v31_v35 = vld [vmem:[%s494_s1 + $0x88] sm:$0xff]  ;;  %v52_v41 = vmul.f32 %v37_v15, %v26_v21  ;;  %v53_v42 = vmul.f32 %v38_v17, %v366_v24  ;;  %v63_v43 = vadd.f32 %v62_v27, %v61_v26  ;;  %v78_v45 = vsel %vm60_vm0, %v46_v23, 0.0 }
   0x9   :  { %v32_v36 = vld [vmem:[%s494_s1 + $0x90] sm:$0xff]  ;;  %v397_v37 = vld [vmem:[%s494_s1 + $0x98] sm:$0xf]  ;;  %v404_v46 = vmul.f32 %v39_v18, %v374_v28  ;;  %v55_v47 = vmul.f32 %v35_v4, %v29_v29  ;;  %v56_v48 = vmul.f32 %v36_v5, %v30_v30  ;;  %v64_v49 = vsel %vm60_vm0, %v42_v25, 0.0  ;;  %v259_v58 = vld [vmem:[%s495_s0 + $0x28] sm:$0xff] }
   0xa   :  { %v57_v50 = vmul.f32 %v37_v15, %v31_v35  ;;  %v58_v51 = vmul.f32 %v38_v17, %v32_v36  ;;  %v408_v52 = vmul.f32 %v39_v18, %v397_v37  ;;  %v411_v53 = vsel %vm60_vm0, %v43_v31, 0.0  ;;  %v260_v59 = vld [vmem:[%s495_s0 + $0x30] sm:$0xff]  ;;  %v261_v15 = vld [vmem:[%s495_s0 + $0x38] sm:$0xff]  ;;  %v262_v31 = vld [vmem:[%s495_s0 + $0x40] sm:$0xff] }
   0xb   :  { %v79_v54 = vadd.f32 %v78_v45, %v77_v44  ;;  %v80_v55 = vsel %vm60_vm0, %v47_v33, 0.0  ;;  %v415_v56 = vsel %vm60_vm0, %v48_v34, 0.0  ;;  %v418_v57 = vsel %vm68_vm1, %v49_v38, 0.0 }
   0xc   :  { %v65_v60 = vadd.f32 %v64_v49, %v63_v43  ;;  %v92_v61 = vsel %vm60_vm0, %v50_v39, 0.0  ;;  %v163_v62 = vmul.f32 %v259_v58, %v19_v9  ;;  %v164_v63 = vmul.f32 %v260_v59, %v20_v10 }
   0xd   :  { %v168_v0 = vmul.f32 %v259_v58, %v24_v19  ;;  %v169_v1 = vmul.f32 %v260_v59, %v25_v20  ;;  %v173_v4 = vmul.f32 %v259_v58, %v29_v29  ;;  %v174_v5 = vmul.f32 %v260_v59, %v30_v30 }
   0xe   :  { %v93_v11 = vsel %vm60_vm0, %v51_v40, 0.0  ;;  %v95_v12 = vsel %vm60_vm0, %v52_v41, 0.0  ;;  %v158_v17 = vmul.f32 %v259_v58, %v294_v2  ;;  %v159_v18 = vmul.f32 %v260_v59, %v299_v3 }
   0xf   :  { %v81_v22 = vadd.f32 %v80_v55, %v79_v54  ;;  %v107_v9 = vsel %vm60_vm0, %v55_v47, 0.0  ;;  %v108_v10 = vsel %vm60_vm0, %v56_v48, 0.0  ;;  %v165_v19 = vmul.f32 %v261_v15, %v333_v13 }
  0x10   :  { %v170_v20 = vmul.f32 %v261_v15, %v26_v21  ;;  %v175_v23 = vmul.f32 %v261_v15, %v31_v35  ;;  %v193_v25 = vsel %vm60_vm0, %v163_v62, 0.0  ;;  %v194_v26 = vsel %vm60_vm0, %v164_v63, 0.0 }
  0x11   :  { %v208_v27 = vsel %vm60_vm0, %v168_v0, 0.0  ;;  %v209_v29 = vsel %vm60_vm0, %v169_v1, 0.0  ;;  %v223_v2 = vsel %vm60_vm0, %v173_v4, 0.0  ;;  %v224_v3 = vsel %vm60_vm0, %v174_v5, 0.0 }
  0x12   :  { %v94_v30 = vadd.f32 %v93_v11, %v92_v61  ;;  %v160_v13 = vmul.f32 %v261_v15, %v310_v6  ;;  %v178_v21 = vsel %vm60_vm0, %v158_v17, 0.0  ;;  %v179_v33 = vsel %vm60_vm0, %v159_v18, 0.0 }
  0x13   :  { %v109_v34 = vadd.f32 %v108_v10, %v107_v9  ;;  %v110_v35 = vsel %vm60_vm0, %v57_v50, 0.0  ;;  %v166_v38 = vmul.f32 %v262_v31, %v338_v14  ;;  %v195_v39 = vadd.f32 %v194_v26, %v193_v25  ;;  %v263_v14 = vld [vmem:[%s495_s0 + $0x48] sm:$0xf] }
  0x14   :  { %v171_v40 = vmul.f32 %v262_v31, %v366_v24  ;;  %v196_v41 = vsel %vm60_vm0, %v165_v19, 0.0  ;;  %v210_v43 = vadd.f32 %v209_v29, %v208_v27  ;;  %v225_v44 = vadd.f32 %v224_v3, %v223_v2 }
  0x15   :  { %v176_v45 = vmul.f32 %v262_v31, %v32_v36  ;;  %v180_v47 = vadd.f32 %v179_v33, %v178_v21  ;;  %v211_v6 = vsel %vm60_vm0, %v170_v20, 0.0  ;;  %v226_v48 = vsel %vm60_vm0, %v175_v23, 0.0 }
  0x16   :  { %v96_v49 = vadd.f32 %v95_v12, %v94_v30  ;;  %v97_v54 = vsel %vm60_vm0, %v53_v42, 0.0  ;;  %v161_v50 = vmul.f32 %v262_v31, %v315_v7  ;;  %v181_v24 = vsel %vm60_vm0, %v160_v13, 0.0 }
  0x17   :  { %v111_v55 = vadd.f32 %v110_v35, %v109_v34  ;;  %v112_v58 = vsel %vm60_vm0, %v58_v51, 0.0  ;;  %v167_v36 = vmul.f32 %v263_v14, %v346_v16  ;;  %v197_v59 = vadd.f32 %v196_v41, %v195_v39 }
  0x18   :  { %v172_v61 = vmul.f32 %v263_v14, %v374_v28  ;;  %v198_v62 = vsel %vm60_vm0, %v166_v38, 0.0  ;;  %v212_v63 = vadd.f32 %v211_v6, %v210_v43  ;;  %v227_v42 = vadd.f32 %v226_v48, %v225_v44 }
  0x19   :  { %v177_v0 = vmul.f32 %v263_v14, %v397_v37  ;;  %v182_v1 = vadd.f32 %v181_v24, %v180_v47  ;;  %v213_v4 = vsel %vm60_vm0, %v171_v40, 0.0  ;;  %v228_v7 = vsel %vm60_vm0, %v176_v45, 0.0 }
  0x1a   :  { %v67_v5 = vadd.f32 %v411_v53, %v65_v60  ;;  %v99_v51 = vsel %vm68_vm1, %v404_v46, 0.0  ;;  %v162_v16 = vmul.f32 %v263_v14, %v320_v8  ;;  %v183_v28 = vsel %vm60_vm0, %v161_v50, 0.0 }
  0x1b   :  { %v83_v11 = vadd.f32 %v415_v56, %v81_v22  ;;  %v98_v12 = vadd.f32 %v97_v54, %v96_v49  ;;  %v113_v15 = vadd.f32 %v112_v58, %v111_v55  ;;  %v199_v17 = vadd.f32 %v198_v62, %v197_v59 }
  0x1c   :  { %v114_v37 = vsel %vm68_vm1, %v408_v52, 0.0  ;;  %v200_v18 = vsel %vm68_vm1, %v167_v36, 0.0  ;;  %v214_v9 = vadd.f32 %v213_v4, %v212_v63  ;;  %v229_v10 = vadd.f32 %v228_v7, %v227_v42 }
  0x1d   :  { %v69_v53 = vsel %vm68_vm1, %v384_v32, 0.0  ;;  %v184_v46 = vadd.f32 %v183_v28, %v182_v1  ;;  %v215_v8 = vsel %vm68_vm1, %v172_v61, 0.0  ;;  %v230_v60 = vsel %vm68_vm1, %v177_v0, 0.0 }
  0x1e   :  { %v185_v56 = vsel %vm68_vm1, %v162_v16, 0.0  ;;  %v85_v22 = vadd.f32 %v418_v57, %v83_v11  ;;  %v100_v19 = vadd.f32 %v99_v51, %v98_v12  ;;  %v115_v20 = vadd.f32 %v114_v37, %v113_v15 }
  0x1f   :  { %v201_v23 = vadd.f32 %v200_v18, %v199_v17  ;;  %v70_v52 = vadd.f32 %v69_v53, %v67_v5  ;;  %v216_v25 = vadd.f32 %v215_v8, %v214_v9  ;;  %v231_v26 = vadd.f32 %v230_v60, %v229_v10 }
  0x20   :  { %v186_v27 = vadd.f32 %v185_v56, %v184_v46  ;;  %v86_v29 = vrot.slane %v85_v22, 4  ;;  %v101_v2 = vrot.slane %v100_v19, 4  ;;  %v116_v3 = vrot.slane %v115_v20, 4 }
  0x21   :  { %v202_v32 = vrot.slane %v201_v23, 4  ;;  %v71_v30 = vrot.slane %v70_v52, 4  ;;  %v217_v31 = vrot.slane %v216_v25, 4  ;;  %v232_v13 = vrot.slane %v231_v26, 4 }
  0x22   :  { %v187_v21 = vrot.slane %v186_v27, 4  ;;  %v87_v33 = vadd.f32 %v86_v29, %v85_v22  ;;  %v102_v34 = vadd.f32 %v101_v2, %v100_v19  ;;  %v117_v35 = vadd.f32 %v116_v3, %v115_v20 }
  0x23   :  { %v203_v38 = vadd.f32 %v202_v32, %v201_v23  ;;  %v72_v57 = vadd.f32 %v71_v30, %v70_v52  ;;  %v218_v39 = vadd.f32 %v217_v31, %v216_v25  ;;  %v233_v40 = vadd.f32 %v232_v13, %v231_v26 }
  0x24   :  { %v188_v41 = vadd.f32 %v187_v21, %v186_v27  ;;  %v88_v43 = vrot.slane %v87_v33, 2  ;;  %v103_v44 = vrot.slane %v102_v34, 2  ;;  %v118_v45 = vrot.slane %v117_v35, 2 }
  0x25   :  { %v204_v47 = vrot.slane %v203_v38, 2  ;;  %v73_v6 = vrot.slane %v72_v57, 2  ;;  %v219_v48 = vrot.slane %v218_v39, 2  ;;  %v234_v49 = vrot.slane %v233_v40, 2 }
  0x26   :  { %v189_v54 = vrot.slane %v188_v41, 2  ;;  %v89_v14 = vadd.f32 %v88_v43, %v87_v33  ;;  %v104_v50 = vadd.f32 %v103_v44, %v102_v34  ;;  %v119_v24 = vadd.f32 %v118_v45, %v117_v35 }
  0x27   :  { %v205_v55 = vadd.f32 %v204_v47, %v203_v38  ;;  %v74_v58 = vadd.f32 %v73_v6, %v72_v57  ;;  %v220_v36 = vadd.f32 %v219_v48, %v218_v39  ;;  %v235_v59 = vadd.f32 %v234_v49, %v233_v40 }
  0x28   :  { %v190_v61 = vadd.f32 %v189_v54, %v188_v41  ;;  %v90_v62 = vrot.slane %v89_v14, 1  ;;  %v105_v63 = vrot.slane %v104_v50, 1  ;;  %v120_v42 = vrot.slane %v119_v24, 1 }
  0x29   :  { %v206_v0 = vrot.slane %v205_v55, 1  ;;  %v75_v1 = vrot.slane %v74_v58, 1  ;;  %v221_v4 = vrot.slane %v220_v36, 1  ;;  %v236_v7 = vrot.slane %v235_v59, 1 }
  0x2a   :  { %v191_v5 = vrot.slane %v190_v61, 1  ;;  %v91_v51 = vadd.f32 %v90_v62, %v89_v14  ;;  %v106_v16 = vadd.f32 %v105_v63, %v104_v50  ;;  %v121_v28 = vadd.f32 %v120_v42, %v119_v24 }
  0x2b   :  { %v207_v11 = vadd.f32 %v206_v0, %v205_v55  ;;  %v76_v15 = vadd.f32 %v75_v1, %v74_v58  ;;  %v222_v17 = vadd.f32 %v221_v4, %v220_v36  ;;  %v237_v37 = vadd.f32 %v236_v7, %v235_v59 }
  0x2c   :  { %v192_v53 = vadd.f32 %v191_v5, %v190_v61 }
  0x81   :  { %v125_v12 = vpop.permute.xlu0 %124 }
  0x82   :  { %v126_v18 = vrot.slane %v125_v12, 1  ;;  %v127_v9 = vrot.slane %v125_v12, 2  ;;  %v128_v10 = vrot.slane %v125_v12, 3  ;;  %v133_v22 = vadd.f32 %v125_v12, %v76_v15 }
  0x83   :  { %v238_v25 = vadd.f32 %v192_v53, %v125_v12 }
  0x84   :  { %v134_v46 = vadd.f32 %v126_v18, %v91_v51  ;;  %v135_v8 = vadd.f32 %v127_v9, %v106_v16  ;;  %v136_v60 = vadd.f32 %v128_v10, %v121_v28  ;;  %v239_v56 = vadd.f32 %v207_v11, %v126_v18 }
  0x85   :  { %v240_v19 = vadd.f32 %v222_v17, %v127_v9  ;;  %v241_v20 = vadd.f32 %v237_v37, %v128_v10 }
  0x86   :  { %v141_v23 = vrot.slane %v134_v46, 7  ;;  %v144_v52 = vrot.slane %v135_v8, 6  ;;  %v246_v26 = vrot.slane %v239_v56, 7  ;;  %v147_v2 = vrot.slane %v136_v60, 5 }
  0x87   :  { %v248_v27 = vrot.slane %v240_v19, 6  ;;  %v250_v32 = vrot.slane %v241_v20, 5 }
  0x88   :  { %v143_v29 = vsel %vm142_vm2, %v141_v23, %v133_v22  ;;  %v247_v3 = vsel %vm142_vm2, %v246_v26, %v238_v25 }
  0x89   :  { %v146_v30 = vsel %vm145_vm3, %v144_v52, %v143_v29  ;;  %v249_v31 = vsel %vm145_vm3, %v248_v27, %v247_v3 }
  0x8a   :  { %v149_v13 = vsel %vm148_vm4, %v147_v2, %v146_v30  ;;  %v251_v21 = vsel %vm148_vm4, %v250_v32, %v249_v31 }
  0x8b   :  { %151 = vst.msk [vmem:[%s496_s3] sm:$0xf] %vm68_vm1, %v149_v13  ;;  %264 = vst.msk [vmem:[%s496_s3 + $0x4] sm:$0xf] %vm68_vm1, %v251_v21 }

</bundles_post_ra>
